<compile_context>
chip_gen: v7x
topology: tpu7x:2x2x1
jax: 0.10.0
libtpu: 0.0.40
codegen_flags: <defaults>
</compile_context>

<pallas_src>
import functools

import jax
import jax.numpy as jnp
import numpy as np
from jax import lax
from jax.experimental import pallas as pl
from jax.experimental.pallas import tpu as pltpu

EPS = 1e-5
EXPANSION = 4
LANE = 128
ROW_TILE = 512          # target row tile for the 1x1 / elementwise passes


def _round_up(x, m):
    return (x + m - 1) // m * m


def _pick_vmem_limit():
    """Generation-aware scoped-VMEM budget (~3/4 of physical, capped).

    v5e/v6e (128 MiB physical) -> 96 MiB, v7x (64 MiB) -> 48 MiB; falls back
    to a conservative 28 MiB if the hardware query is unavailable.
    """
    try:
        cap = getattr(pltpu.get_tpu_info(), "vmem_capacity_bytes", None)
        if cap:
            return int(min(cap * 3 // 4, 112 * 1024 * 1024))
    except Exception:
        pass
    return 28 * 1024 * 1024


def _row_pad(a, rows_pad):
    if a.shape[0] == rows_pad:
        return a
    return jnp.zeros((rows_pad,) + a.shape[1:], a.dtype).at[: a.shape[0]].set(a)


def _accum_stats(stats_ref, y):
    """Accumulate per-channel sum / sum-of-squares of y (rows, C) into (1,2,C)."""
    stats_ref[0, 0:1, :] += jnp.sum(y, axis=0, keepdims=True)
    stats_ref[0, 1:2, :] += jnp.sum(y * y, axis=0, keepdims=True)


def _normalize(y, stats, inv_count):
    """BatchNorm (affine=False, training): single-pass mean / biased variance."""
    mean = stats[0:1, :] * inv_count
    var = jnp.maximum(stats[1:2, :] * inv_count - mean * mean, 0.0)
    return (y - mean) * lax.rsqrt(var + EPS)


# ------------------------------ pass A ---------------------------------------
def _conv1x1_stats_kernel(x_ref, w_ref, y_ref, stats_ref):
    @pl.when(pl.program_id(1) == 0)
    def _():
        stats_ref[...] = jnp.zeros_like(stats_ref)

    y = jnp.dot(x_ref[...], w_ref[...], preferred_element_type=jnp.float32)
    y_ref[...] = y.astype(y_ref.dtype)                        # bf16 intermediate
    _accum_stats(stats_ref, y)                                # padded rows are 0


# ------------------------------ pass B ---------------------------------------
def _bn_relu_conv3x3_stats_kernel(y_ref, s_in_ref, w_ref, z_ref, stats_ref, *,
                                  H, W, n_images, inv_count):
    @pl.when(pl.program_id(1) == 0)
    def _():
        stats_ref[...] = jnp.zeros_like(stats_ref)

    C = y_ref.shape[-1]
    stats_in = s_in_ref[0] + s_in_ref[1]                      # sum core partials
    y = _normalize(y_ref[...].astype(jnp.float32), stats_in, inv_count)
    y = jnp.maximum(y, 0.0).astype(jnp.bfloat16).reshape(H, W, C)

    # 1-pixel zero halo (SAME padding), built in bf16.
    zrow = jnp.zeros((1, W, C), jnp.bfloat16)
    yp = jnp.concatenate([zrow, y, zrow], axis=0)             # (H+2, W,   C)
    zcol = jnp.zeros((H + 2, 1, C), jnp.bfloat16)
    yp = jnp.concatenate([zcol, yp, zcol], axis=1)            # (H+2, W+2, C)

    # 3x3 conv as 9 accumulated (HW, C) x (C, C) MXU matmuls over statically
    # shifted views of the halo-padded activation (no 9x im2col buffer).
    acc = jnp.zeros((H * W, C), jnp.float32)
    for t in range(9):
        kh, kw = t // 3, t % 3
        tap = yp[kh:kh + H, kw:kw + W, :].reshape(H * W, C)
        acc = acc + jnp.dot(tap, w_ref[t], preferred_element_type=jnp.float32)

    z_ref[...] = acc.astype(z_ref.dtype)                      # bf16 intermediate

    # Guard statistics against the fictitious padding image when N is odd.
    img = pl.program_id(0) * pl.num_programs(1) + pl.program_id(1)

    @pl.when(img < n_images)
    def _():
        _accum_stats(stats_ref, acc)


# ------------------------------ pass C ---------------------------------------
def _bn_relu_conv1x1_stats_kernel(y_ref, s_in_ref, w_ref, u_ref, stats_ref, *,
                                  inv_count, n_rows, block_rows):
    @pl.when(pl.program_id(1) == 0)
    def _():
        stats_ref[...] = jnp.zeros_like(stats_ref)

    stats_in = s_in_ref[0] + s_in_ref[1]                      # sum core partials
    y = _normalize(y_ref[...].astype(jnp.float32), stats_in, inv_count)
    y = jnp.maximum(y, 0.0)

    # Zero any padded rows (row >= n_rows) so they contribute nothing to the
    # conv3 output nor to the BN3 statistics.
    row0 = (pl.program_id(0) * pl.num_programs(1) + pl.program_id(1)) * block_rows
    row_ids = row0 + lax.broadcasted_iota(jnp.int32, (block_rows, 1), 0)
    y = jnp.where(row_ids < n_rows, y, 0.0).astype(jnp.bfloat16)

    u = jnp.dot(y, w_ref[...], preferred_element_type=jnp.float32)
    u_ref[...] = u.astype(u_ref.dtype)                        # bf16 intermediate
    _accum_stats(stats_ref, u)


# ------------------------------ pass D ---------------------------------------
def _bn_residual_relu_kernel(u_ref, s_in_ref, x_ref, o_ref, *, inv_count):
    stats_in = s_in_ref[0] + s_in_ref[1]                      # sum core partials
    u = _normalize(u_ref[...].astype(jnp.float32), stats_in, inv_count)
    o_ref[...] = jnp.maximum(u + x_ref[...], 0.0)


# ------------------------------ wrapper ---------------------------------------
def bottleneck_pallas(x_nhwc, w1, w2, w3):
    """x_nhwc: (N,H,W,Cin); w1: (Cin,P); w2: (3,3,P,P) HWIO; w3: (P,4P)."""
    N, H, W, Cin = x_nhwc.shape
    Cin_w, P = w1.shape
    assert Cin_w == Cin
    assert Cin == P * EXPANSION, "downsample=None requires inplanes == planes*4"
    HW = H * W
    # TODO(synk): relax to arbitrary spatial sizes (needs HW padding in pass B).
    assert HW % 16 == 0, "H*W must be a multiple of 16 for bf16 row blocks"

    f32, bf16 = jnp.float32, jnp.bfloat16
    rows = N * HW
    n_pad = _round_up(N, 2)                       # images, padded for 2-core split
    tr = max(16, (min(ROW_TILE, (n_pad // 2) * HW) // 16) * 16)
    rows_pad = _round_up(n_pad * HW, 2 * tr)
    rb = rows_pad // (2 * tr)                     # row blocks per core (A, C)
    nb = n_pad // 2                               # images per core     (B)

    Pp = _round_up(P, LANE)                       # lane-dense bottleneck channels
    inv_count = 1.0 / float(rows)                 # BN stats over the full batch

    # Input: flatten (free reshape), row-pad with zeros, cast matmul copy to bf16.
    x_flat = x_nhwc.reshape(rows, Cin).astype(f32)
    xb = _row_pad(x_flat, rows_pad).astype(bf16)  # conv1 input       (pass A)
    xr = _row_pad(x_flat, rows_pad)               # f32 residual      (pass D)

    # Weights: pad bottleneck channels to 128, cast to bf16 (layout plumbing).
    w1p = jnp.zeros((Cin, Pp), bf16).at[:, :P].set(w1.astype(bf16))
    w2p = jnp.zeros((3, 3, Pp, Pp), bf16).at[:, :, :P, :P].set(
        w2.astype(bf16)).reshape(9, Pp, Pp)
    w3p = jnp.zeros((Pp, Cin), bf16).at[:P, :].set(w3.astype(bf16))

    def rowblk(c):        # (tr, c) row tile for grid (2, rb)
        return pl.BlockSpec((tr, c), lambda co, r: (co * rb + r, 0))

    def imgblk(c):        # (HW, c) per-image tile for grid (2, nb)
        return pl.BlockSpec((HW, c), lambda co, i: (co * nb + i, 0))

    def statsblk(c):      # per-core partial-stats slab (revisited block)
        return pl.BlockSpec((1, 2, c), lambda co, i: (co, 0, 0))

    def full(shape):      # small array resident every step (2-D grid)
        return pl.BlockSpec(shape, lambda co, i: (0,) * len(shape))

    vmem_limit = _pick_vmem_limit()
    params_acc = pltpu.CompilerParams(
        dimension_semantics=("parallel", "arbitrary"), vmem_limit_bytes=vmem_limit)
    params_par = pltpu.CompilerParams(
        dimension_semantics=("parallel",), vmem_limit_bytes=vmem_limit)

    # ---- pass A: conv1 (1x1) + stats1 ---------------------------------------
    y1, s1 = pl.pallas_call(
        _conv1x1_stats_kernel,
        grid=(2, rb),
        in_specs=[rowblk(Cin), full((Cin, Pp))],
        out_specs=(rowblk(Pp), statsblk(Pp)),
        out_shape=(jax.ShapeDtypeStruct((rows_pad, Pp), bf16),
                   jax.ShapeDtypeStruct((2, 2, Pp), f32)),
        compiler_params=params_acc,
    )(xb, w1p)

    # ---- pass B: BN1 + ReLU + conv2 (3x3, 9 shifted matmuls) + stats2 -------
    y2, s2 = pl.pallas_call(
        functools.partial(_bn_relu_conv3x3_stats_kernel,
                          H=H, W=W, n_images=N, inv_count=inv_count),
        grid=(2, nb),
        in_specs=[imgblk(Pp), full((2, 2, Pp)), full((9, Pp, Pp))],
        out_specs=(imgblk(Pp), statsblk(Pp)),
        out_shape=(jax.ShapeDtypeStruct((rows_pad, Pp), bf16),
                   jax.ShapeDtypeStruct((2, 2, Pp), f32)),
        compiler_params=params_acc,
    )(y1, s1, w2p)

    # ---- pass C: BN2 + ReLU + conv3 (1x1) + stats3 --------------------------
    u, s3 = pl.pallas_call(
        functools.partial(_bn_relu_conv1x1_stats_kernel,
                          inv_count=inv_count, n_rows=rows, block_rows=tr),
        grid=(2, rb),
        in_specs=[rowblk(Pp), full((2, 2, Pp)), full((Pp, Cin))],
        out_specs=(rowblk(Cin), statsblk(Cin)),
        out_shape=(jax.ShapeDtypeStruct((rows_pad, Cin), bf16),
                   jax.ShapeDtypeStruct((2, 2, Cin), f32)),
        compiler_params=params_acc,
    )(y2, s2, w3p)

    # ---- pass D: BN3 + residual + ReLU (no accumulator -> fully parallel) ---
    out = pl.pallas_call(
        functools.partial(_bn_residual_relu_kernel, inv_count=inv_count),
        grid=(rows_pad // tr,),
        in_specs=[pl.BlockSpec((tr, Cin), lambda r: (r, 0)),
                  pl.BlockSpec((2, 2, Cin), lambda r: (0, 0, 0)),
                  pl.BlockSpec((tr, Cin), lambda r: (r, 0))],
        out_specs=pl.BlockSpec((tr, Cin), lambda r: (r, 0)),
        out_shape=jax.ShapeDtypeStruct((rows_pad, Cin), f32),
        compiler_params=params_par,
    )(u, s3, xr)

    return out[:rows].reshape(N, H, W, Cin)


# ---------------------------- pure-JAX reference -----------------------------
def bottleneck_ref(x_nhwc, w1, w2, w3, matmul_dtype=jnp.float32):
    """Reference. matmul_dtype=bfloat16 mirrors the kernel's MXU numerics."""
    def bn(y, relu=True):
        mean = jnp.mean(y, axis=(0, 1, 2), keepdims=True)
        var = jnp.mean((y - mean) ** 2, axis=(0, 1, 2), keepdims=True)
        y = (y - mean) * lax.rsqrt(var + EPS)
        return jnp.maximum(y, 0.0) if relu else y

    dn = ('NHWC', 'HWIO', 'NHWC')

    def conv(a, w, padding):
        return lax.conv_general_dilated(
            a.astype(matmul_dtype), w.astype(matmul_dtype),
            window_strides=(1, 1), padding=padding, dimension_numbers=dn,
            preferred_element_type=jnp.float32)

    Cin, P = w1.shape
    out = bn(conv(x_nhwc, w1.reshape(1, 1, Cin, P), 'VALID'))
    out = bn(conv(out, w2, 'SAME'))
    out = bn(conv(out, w3.reshape(1, 1, P, P * EXPANSION), 'VALID'), relu=False)
    return jnp.maximum(out + x_nhwc, 0.0)


if __name__ == "__main__":
    # Small shapes consistent with the module: planes=8 -> inplanes = 4*8 = 32.
    N, H, W = 2, 8, 8
    planes = 8
    inplanes = planes * EXPANSION                 # 32 (so the residual add works)

    key = jax.random.PRNGKey(0)
    kx, k1, k2, k3 = jax.random.split(key, 4)

    # PyTorch input is NCHW; build it that way, then transpose to NHWC.
    x_nchw = jax.random.normal(kx, (N, inplanes, H, W), jnp.float32)
    x_nhwc = jnp.transpose(x_nchw, (0, 2, 3, 1))

    # Deterministic synthetic weights in kernel-friendly layouts.
    w1 = jax.random.normal(k1, (inplanes, planes), jnp.float32) * 0.1            # conv1 (1x1)
    w2 = jax.random.normal(k2, (3, 3, planes, planes), jnp.float32) * 0.1        # conv2 (3x3) HWIO
    w3 = jax.random.normal(k3, (planes, planes * EXPANSION), jnp.float32) * 0.1  # conv3 (1x1)

    out = jax.block_until_ready(bottleneck_pallas(x_nhwc, w1, w2, w3))

    # Check against a reference with the same bf16-input / f32-accumulate matmuls
    # (the kernel additionally stores intermediates in bf16 -> slightly looser).
    ref_bf16 = jax.block_until_ready(bottleneck_ref(x_nhwc, w1, w2, w3, jnp.bfloat16))
    np.testing.assert_allclose(np.asarray(out), np.asarray(ref_bf16),
                               rtol=5e-2, atol=5e-2)

    # Sanity check against the full-f32 module semantics (bf16 rounding only).
    ref_f32 = jax.block_until_ready(bottleneck_ref(x_nhwc, w1, w2, w3, jnp.float32))
    np.testing.assert_allclose(np.asarray(out), np.asarray(ref_f32),
                               rtol=1e-1, atol=1e-1)

    print("KERNEL_OK")
</pallas_src>

<mosaic_0001>
module attributes {stable_mosaic.version = 11 : i64} {
  func.func @_conv1x1_stats_kernel(%arg0: i32, %arg1: i32, %arg2: memref<64x32xbf16, #tpu.memory_space<vmem>>, %arg3: memref<32x128xbf16, #tpu.memory_space<vmem>>, %arg4: memref<64x128xbf16, #tpu.memory_space<vmem>>, %arg5: memref<1x2x128xf32, #tpu.memory_space<vmem>>) attributes {dimension_semantics = [#tpu.dimension_semantics<parallel>, #tpu.dimension_semantics<arbitrary>], iteration_bounds = array<i64: 2, 1>, scalar_prefetch = 0 : i64, scratch_operands = 0 : i64, tpu.core_type = #tpu.core_type<tc>, window_params = [{transform_indices = @transform_0, window_bounds = array<i64: 64, 32>}, {pipeline_mode = #tpu.pipeline_mode<synchronous>, transform_indices = @transform_1, window_bounds = array<i64: 32, 128>}, {transform_indices = @transform_2, window_bounds = array<i64: 64, 128>}, {transform_indices = @transform_3, window_bounds = array<i64: 1, 2, 128>}]} {
    %c0_i32 = arith.constant 0 : i32
    %0 = arith.cmpi eq, %arg1, %c0_i32 : i32
    %1 = arith.extui %0 : i1 to i32
    %c0_i32_0 = arith.constant 0 : i32
    %2 = arith.cmpi ne, %1, %c0_i32_0 : i32
    scf.if %2 {
      %cst_19 = arith.constant 0.000000e+00 : f32
      %25 = vector.broadcast %cst_19 : f32 to vector<1x2x128xf32>
      %c0_20 = arith.constant 0 : index
      %c0_21 = arith.constant 0 : index
      %c0_22 = arith.constant 0 : index
      %26 = vector.load %arg5[%c0_20, %c0_21, %c0_22] : memref<1x2x128xf32, #tpu.memory_space<vmem>>, vector<1x2x128xf32>
      tpu.vector_store %arg5[%c0_20, %c0_21, %c0_22], %25 {strides = array<i32>} : memref<1x2x128xf32, #tpu.memory_space<vmem>>, vector<1x2x128xf32>,
    } else {
    }
    %c0 = arith.constant 0 : index
    %c0_1 = arith.constant 0 : index
    %3 = vector.load %arg2[%c0, %c0_1] : memref<64x32xbf16, #tpu.memory_space<vmem>>, vector<64x32xbf16>
    %c0_2 = arith.constant 0 : index
    %c0_3 = arith.constant 0 : index
    %4 = vector.load %arg3[%c0_2, %c0_3] : memref<32x128xbf16, #tpu.memory_space<vmem>>, vector<32x128xbf16>
    %cst = arith.constant dense<0.000000e+00> : vector<64x128xf32>
    %5 = tpu.matmul %3, %4, %cst {dimension_numbers = #tpu.dot_dimension_numbers<[1], [0], [0], [1], [0, 0, 1, 1], [], []>} : vector<64x32xbf16>, vector<32x128xbf16>, vector<64x128xf32> -> vector<64x128xf32>
    %6 = arith.truncf %5 : vector<64x128xf32> to vector<64x128xbf16>
    %c0_4 = arith.constant 0 : index
    %c0_5 = arith.constant 0 : index
    %7 = vector.load %arg4[%c0_4, %c0_5] : memref<64x128xbf16, #tpu.memory_space<vmem>>, vector<64x128xbf16>
    tpu.vector_store %arg4[%c0_4, %c0_5], %6 {strides = array<i32>} : memref<64x128xbf16, #tpu.memory_space<vmem>>, vector<64x128xbf16>,
    %c0_6 = arith.constant 0 : index
    %c0_7 = arith.constant 0 : index
    %c0_8 = arith.constant 0 : index
    %8 = vector.load %arg5[%c0_6, %c0_7, %c0_8] : memref<1x2x128xf32, #tpu.memory_space<vmem>>, vector<1x1x128xf32>
    %9 = vector.shape_cast %8 : vector<1x1x128xf32> to vector<1x128xf32>
    %cst_9 = arith.constant dense<0.000000e+00> : vector<128xf32>
    %10 = vector.multi_reduction <add>, %5, %cst_9 [0] : vector<64x128xf32> to vector<128xf32>
    %11 = vector.shape_cast %10 : vector<128xf32> to vector<1x128xf32>
    %12 = arith.addf %9, %11 : vector<1x128xf32>
    %c0_10 = arith.constant 0 : index
    %c0_11 = arith.constant 0 : index
    %c0_12 = arith.constant 0 : index
    %13 = vector.load %arg5[%c0_10, %c0_11, %c0_12] : memref<1x2x128xf32, #tpu.memory_space<vmem>>, vector<1x1x128xf32>
    %14 = vector.shape_cast %13 : vector<1x1x128xf32> to vector<1x128xf32>
    %15 = vector.shape_cast %12 : vector<1x128xf32> to vector<1x1x128xf32>
    tpu.vector_store %arg5[%c0_10, %c0_11, %c0_12], %15 {strides = array<i32>} : memref<1x2x128xf32, #tpu.memory_space<vmem>>, vector<1x1x128xf32>,
    %c0_13 = arith.constant 0 : index
    %c1 = arith.constant 1 : index
    %c0_14 = arith.constant 0 : index
    %16 = vector.load %arg5[%c0_13, %c1, %c0_14] : memref<1x2x128xf32, #tpu.memory_space<vmem>>, vector<1x1x128xf32>
    %17 = vector.shape_cast %16 : vector<1x1x128xf32> to vector<1x128xf32>
    %18 = arith.mulf %5, %5 : vector<64x128xf32>
    %cst_15 = arith.constant dense<0.000000e+00> : vector<128xf32>
    %19 = vector.multi_reduction <add>, %18, %cst_15 [0] : vector<64x128xf32> to vector<128xf32>
    %20 = vector.shape_cast %19 : vector<128xf32> to vector<1x128xf32>
    %21 = arith.addf %17, %20 : vector<1x128xf32>
    %c0_16 = arith.constant 0 : index
    %c1_17 = arith.constant 1 : index
    %c0_18 = arith.constant 0 : index
    %22 = vector.load %arg5[%c0_16, %c1_17, %c0_18] : memref<1x2x128xf32, #tpu.memory_space<vmem>>, vector<1x1x128xf32>
    %23 = vector.shape_cast %22 : vector<1x1x128xf32> to vector<1x128xf32>
    %24 = vector.shape_cast %21 : vector<1x128xf32> to vector<1x1x128xf32>
    tpu.vector_store %arg5[%c0_16, %c1_17, %c0_18], %24 {strides = array<i32>} : memref<1x2x128xf32, #tpu.memory_space<vmem>>, vector<1x1x128xf32>,
    return
  }
  func.func @transform_0(%arg0: i32, %arg1: i32) -> (i32, i32) {
    %c1_i32 = arith.constant 1 : i32
    %0 = arith.muli %arg0, %c1_i32 : i32
    %1 = arith.addi %0, %arg1 : i32
    %c0_i32 = arith.constant 0 : i32
    %c0_i32_0 = arith.constant 0 : i32
    return %1, %c0_i32 : i32, i32
  }
  func.func @transform_1(%arg0: i32, %arg1: i32) -> (i32, i32) {
    %c0_i32 = arith.constant 0 : i32
    %c0_i32_0 = arith.constant 0 : i32
    %c0_i32_1 = arith.constant 0 : i32
    return %c0_i32, %c0_i32_0 : i32, i32
  }
  func.func @transform_2(%arg0: i32, %arg1: i32) -> (i32, i32) {
    %c1_i32 = arith.constant 1 : i32
    %0 = arith.muli %arg0, %c1_i32 : i32
    %1 = arith.addi %0, %arg1 : i32
    %c0_i32 = arith.constant 0 : i32
    %c0_i32_0 = arith.constant 0 : i32
    return %1, %c0_i32 : i32, i32
  }
  func.func @transform_3(%arg0: i32, %arg1: i32) -> (i32, i32, i32) {
    %c0_i32 = arith.constant 0 : i32
    %c0_i32_0 = arith.constant 0 : i32
    %c0_i32_1 = arith.constant 0 : i32
    return %arg0, %c0_i32, %c0_i32_0 : i32, i32, i32
  }
}

</mosaic_0001>

<bundles_post_ra>
// kernel: tpu_custom_call.1
= control target key start
LH: loop header
LB: loop body
LE: loop exit
PB: predicated region body
PF: predicated region fallthrough
CT: control target
= control target key end

     0   :  { %9 = vsyncpa [#allocation3], 0  ;;  %s1005_s0 = inlined_call_operand.vmem [shape: bf16[128,32], index: 0, kind: input, shape index: {}]   ;;  %s1006_s1 = inlined_call_operand.vmem [shape: bf16[32,128], index: 1, kind: input, shape index: {}]   ;;  %s1007_s2 = inlined_call_operand.hbm [shape: bf16[128,128], index: 2, kind: output, shape index: {0}]   ;;  %s1008_s3 = inlined_call_operand.hbm [shape: f32[2,2,128], index: 3, kind: output, shape index: {1}]  }
   0x1   :  { %11 = vsyncpa [#allocation3 + $0x1], 0 }
   0x2   :  { %12 = vsyncpa [#allocation5], 0 }
   0x3   :  { %14 = vsyncpa [#allocation5 + $0x1], 0  ;;  %s843_s12 = smov 0   ;;  %s845_s13 = smov 0  }
   0x4   :  { %s847_s14 = smov 0   ;;  %s849_s15 = smov 0  }
   0x5   :  { %s851_s16 = smov 0   ;;  %s853_s17 = smov 0  }
   0x6 LB: > { %s549_s18 = sadd.s32 4294967295, %s816_s17   ;;  %s550_s19 = sadd.s32 4294967294, %s816_s17   ;;  %s816_s17 = sphi %s853_s17, %s20_s17   ;;  %s812_s16 = sphi %s851_s16, %s1015_s16   ;;  %s808_s15 = sphi %s849_s15, %s1014_s15   ;;  %s804_s14 = sphi %s847_s14, %s1013_s14   ;;  %s800_s13 = sphi %s845_s13, %s1012_s13   ;;  %s796_s12 = sphi %s843_s12, %s1011_s12  }
   0x7   : > { %s32_s20 = sadd.s32 1, %s812_s16  ;;  %s90_s21 = sadd.s32 1, %s804_s14 }
   0x8   : > { %p34_p0 = scmp.ge.s32.totalorder %s32_s20, 2  ;;  %p100_p1 = scmp.ne.s32.totalorder %s804_s14, %s800_s13 }
   0x9   : > { %p101_p2 = scmp.eq.s32.totalorder %s549_s18, 1  ;;  %p106_p3 = scmp.ne.s32.totalorder %s800_s13, %s796_s12 }
   0xa   : > { %s1017_s20 = smov (%p34_p0, %s32_s20), 0  ;;  %p107_p5 = scmp.eq.s32.totalorder %s550_s19, 1 }
   0xb   : > { %p883_p4 = por %p101_p2, %p100_p1  ;;  %s87_s23 = ssub.s32 %s812_s16, %s1017_s20 }
   0xc   : > { %p553_p6 = scmp.ge.s32.totalorder %s816_s17, 1  ;;  %p88_p7 = scmp.eq.s32.totalorder %s87_s23, 0 }
   0xd   : > { %p890_p8 = por %p107_p5, %p106_p3  ;;  %p165_p9 = scmp.lt.s32.totalorder %s816_s17, 3 }
   0xe   : > { %s896_s25 = scalar_select %p88_p7, %s804_s14, %s90_s21  }
   0xf   : > { %p166_p10 = pnand %p553_p6, %p165_p9 }
  0x10   : > { %v700_v0 = vld [vmem:[%s1006_s1] sm:$0xff] (!%p166_p10)   ;;  %s556_s28 = sshll.u32 (!%p166_p10), %s808_s15, 3  ;;  %v701_v1 = vld [vmem:[%s1006_s1 + $0x8] sm:$0xff] (!%p166_p10)   ;;  %vm255_vm0 = vcmask (!%p166_p10), 261120   ;;  %s909_s8 = sand.u32 (!%p166_p10), 1, %s800_s13   ;;  %v818_v6 = vmov (!%p166_p10), 0.0  }
  0x11   : > { %169 = sbr.rel (%p166_p10) target bundleno = 299 (0x12b), region = 28  ;;  %p197_p11 = scmp.lt.s32.totalorder (!%p166_p10), %s556_s28, 15  ;;  %621 = vmatprep.subr.bf16.mxu0 (!%p166_p10), %v700_v0  ;;  %633 = vmatprep.subr.bf16.mxu1 (!%p166_p10), %v700_v0 }
  0x12   : > { %622 = vmatpush3.bf16.msra.mxu0 (!%p166_p10), %v700_v0  ;;  %635 = vmatpush3.bf16.msra.mxu1 (!%p166_p10), %v700_v0  ;;  %s555_s9 = sshll.u32 (!%p166_p10), %s909_s8, 1  ;;  %s554_s11 = sshll.u32 (!%p166_p10), %s909_s8, 5 }
  0x13   : > { %623 = vmatprep.subr.bf16.mxu0 (!%p166_p10), %v701_v1  ;;  %634 = vmatprep.subr.bf16.mxu1 (!%p166_p10), %v701_v1  ;;  %s912_s10 = scalar_lea.vmem (!%p166_p10), [#allocation4], %s555_s9  ;;  %s187_s18 = scalar_lea.vmem (!%p166_p10), [#allocation2], %s554_s11 }
  0x14   : > { %210 = vst [vmem:[%s912_s10] sm:$0x3] (!%p166_p10), %v818_v6  ;;  %s433_s19 = sshll.u32 (!%p166_p10), %s187_s18, 4  ;;  %s591_s21 = sshll.u32 (!%p166_p10), %s808_s15, 9  ;;  %s917_s19 = int_to_ptr.vmem [resolvable:$true] %s433_s19 }
  0x15   : > { %s922_s27 = scalar_lea.hbm (!%p166_p10), %s1007_s2, %s591_s21  ;;  %s706_s29 = scalar_lea.vmem (!%p166_p10), %s917_s19, 512 }
  0x16   : > { %624 = vmatpush3.bf16.msra.mxu0 (!%p166_p10), %v701_v1  ;;  %636 = vmatpush3.bf16.msra.mxu1 (!%p166_p10), %v701_v1  ;;  %p707_p12 = scmp.ne.s32.totalorder (!%p166_p10), %s917_s19, %s706_s29  ;;  %s819_s30 = smov (!%p166_p10), [#allocation2]  }
  0x18   : > { %s1019_s28 = smov (!%p197_p11, %s556_s28), 15  ;;  %p708_p13 = pnand %p707_p12, %p883_p4 }
  0x19   : > { %s557_s4 = sshll.u32 %s1019_s28, 2  ;;  %s414_s28 = scalar_lea.sflag [#allocation3], %s909_s8 }
  0x1a   : > { %s200_s7 = scalar_lea.vmem %s1005_s0, %s557_s4  ;;  %p709_p0 = pneg %p708_p13 }
  0x1b   : > { %v702_v2 = vld [vmem:[%s200_s7] sm:$0xff]   ;;  %v703_v3 = vld [vmem:[%s200_s7 + $0x8] sm:$0xff]   ;;  %v704_v4 = vld [vmem:[%s200_s7 + $0x10] sm:$0xff]   ;;  %s710_s4 = sshll.u32 %s819_s30, 4  ;;  %s711_s4 = int_to_ptr.vmem [resolvable:$false] %s710_s4 }
  0x1c   : > { %625 = vmatprep.mubr.msk.bf16.mxu0 %vm255_vm0, %v702_v2  ;;  %v705_v5 = vld [vmem:[%s200_s7 + $0x18] sm:$0xff]   ;;  %629 = vmatprep.mubr.msk.bf16.mxu1 %vm255_vm0, %v704_v4  ;;  %s712_s5 = scalar_lea.vmem %s711_s4, 1024  ;;  %p713_p1 = scmp.lt.s32.totalorder %s917_s19, %s711_s4 }
  0x1d   : > { %626 = vmatmul.mubr.msk.bf16.vlgmr.msra.gmra.mrb[0].mxu0 %vm255_vm0, %v703_v3  ;;  %630 = vmatmul.mubr.msk.bf16.vlgmr.msra.gmra.mrb[0].mxu1 %vm255_vm0, %v705_v5  ;;  %p714_p2 = scmp.lt.s32.totalorder %s712_s5, %s706_s29 }
  0x1f   : > { %p715_p3 = por %p714_p2, %p713_p1 }
  0x21   : > { %p716_p5 = pnand %p715_p3, %p709_p0 }
  0xf0   : > { %v627_v7 = vpop.f32.mrb[0].mxu0  ;;  %v631_v10 = vpop.f32.mrb[0].mxu1 }
  0xf1   : > { %v302_v8 = vpop.f32.mrb[1].mxu0  ;;  %v318_v13 = vpop.f32.mrb[1].mxu1  ;;  %v392_v21 = vmul.f32 %v627_v7, %v627_v7 }
  0xf2   : > { %v628_v9 = vpop.f32.mrb[2].mxu0  ;;  %v390_v14 = vmul.f32 %v302_v8, %v302_v8  ;;  %v632_v18 = vpop.f32.mrb[2].mxu1  ;;  %v394_v28 = vmul.f32 %v318_v13, %v318_v13 }
  0xf3   : > { %v600_v11 = vpack.c.bf16 %v628_v9, %v627_v7  ;;  %v305_v12 = vpop.f32.mrb[3].mxu0  ;;  %v610_v19 = vpack.c.bf16 %v632_v18, %v631_v10  ;;  %v321_v20 = vpop.f32.mrb[3].mxu1  ;;  %v393_v25 = vmul.f32 %v628_v9, %v628_v9 }
  0xf4   : > { %v595_v15 = vpack.c.bf16 %v305_v12, %v302_v8  ;;  %v374_v16 = vadd.f32 %v305_v12, %v302_v8  ;;  %v391_v17 = vmul.f32 %v305_v12, %v305_v12  ;;  %v605_v24 = vpack.c.bf16 %v321_v20, %v318_v13 }
  0xf5   : > { %612 = vst [vmem:[%s187_s18 + $0x8] sm:$0xff] %v600_v11   ;;  %614 = vst [vmem:[%s187_s18 + $0x18] sm:$0xff] %v610_v19  }
  0xf6   : > { %596 = vst [vmem:[%s187_s18] sm:$0xff] %v595_v15   ;;  %v375_v22 = vadd.f32 %v627_v7, %v374_v16  ;;  %v398_v23 = vadd.f32 %v391_v17, %v390_v14  ;;  %613 = vst [vmem:[%s187_s18 + $0x10] sm:$0xff] %v605_v24  }
  0xf8   : > { %v399_v26 = vadd.f32 %v398_v23, %v392_v21  ;;  %v376_v27 = vadd.f32 %v628_v9, %v375_v22 }
  0xf9   : > { %719 = shalt.err (!%p716_p5)
}
  0xfa   : > { %s720_s6 = scalar_lea.hbm %s922_s27, 512  ;;  %s724_s11 = scalar_lea.hbm %s1007_s2, 1024 }
  0xfb   : > { %p721_p6 = scmp.ne.s32.totalorder %s922_s27, %s720_s6  ;;  %p725_p10 = scmp.lt.u32.totalorder %s922_s27, %s1007_s2 }
  0xfc   : > { %p726_p11 = scmp.lt.u32.totalorder %s724_s11, %s720_s6  ;;  %p728_p13 = scmp.lt.u32.totalorder %s720_s6, %s922_s27 }
  0xfd   : > { %p722_p7 = pnand %p721_p6, %p883_p4 }
  0xfe   : > { %p727_p12 = por %p726_p11, %p725_p10 }
  0xff   : > { %p723_p9 = pneg %p722_p7 }
 0x100   : > { %p729_p0 = por %p728_p13, %p727_p12 }
 0x102   : > { %p730_p1 = pnand %p729_p0, %p723_p9 }
 0x104   : > { %733 = shalt.err (!%p730_p1)
}
 0x105   : > { %s820_s23 = smov 64   ;;  %s821_s26 = smov 4   ;;  %v377_v29 = vadd.f32 %v376_v27, %v318_v13  ;;  %v400_v30 = vadd.f32 %v399_v26, %v393_v25  ;;  %v395_v33 = vmul.f32 %v321_v20, %v321_v20  ;;  %v396_v34 = vmul.f32 %v631_v10, %v631_v10  ;;  %v373_v50 = vld [vmem:[%s912_s10] sm:$0x1]  ;;  %v389_v53 = vld [vmem:[%s912_s10 + $0x1] sm:$0x1] }
 0x106   : > { %637 = dma.vmem_to_hbm [thread:$0]  (%p883_p4), %s917_s19, 512, %s922_s27, %s414_s28, %s820_s23, %s820_s23, %s821_s26   ;;  %v397_v37 = vmul.f32 %v632_v18, %v632_v18 }
 0x107   : > { %v401_v31 = vadd.f32 %v400_v30, %v394_v28  ;;  %v378_v32 = vadd.f32 %v377_v29, %v321_v20  ;;  %s580_s19 = sshll.u32 %s808_s15, 5  ;;  %s449_s27 = sshll.u32 %s912_s10, 4  ;;  %s958_s27 = int_to_ptr.vmem [resolvable:$true] %s449_s27 }
 0x108   : > { %s956_s30 = scalar_lea.hbm %s1008_s3, %s580_s19  ;;  %s419_s4 = scalar_lea.sflag [#allocation5], %s909_s8 }
 0x109   : > { %v379_v35 = vadd.f32 %v631_v10, %v378_v32  ;;  %v402_v36 = vadd.f32 %v401_v31, %v395_v33  ;;  %s734_s5 = scalar_lea.vmem %s958_s27, 32  ;;  %s822_s15 = smov [#allocation4]  }
 0x10a   : > { %p735_p2 = scmp.ne.s32.totalorder %s958_s27, %s734_s5  ;;  %s738_s6 = sshll.u32 %s822_s15, 4  ;;  %s739_s6 = int_to_ptr.vmem [resolvable:$false] %s738_s6 }
 0x10b   : > { %v380_v38 = vadd.f32 %v632_v18, %v379_v35  ;;  %v403_v39 = vadd.f32 %v402_v36, %v396_v34  ;;  %s740_s7 = scalar_lea.vmem %s739_s6, 64  ;;  %p741_p6 = scmp.lt.s32.totalorder %s958_s27, %s739_s6 }
 0x10c   : > { %p736_p3 = pnand %p735_p2, %p883_p4  ;;  %p742_p7 = scmp.lt.s32.totalorder %s740_s7, %s734_s5 }
 0x10d   : > { %v381_v40 = vrot.slane %v380_v38, 4  ;;  %v404_v41 = vadd.f32 %v403_v39, %v397_v37 }
 0x10e   : > { %p737_p5 = pneg %p736_p3  ;;  %p743_p9 = por %p742_p7, %p741_p6 }
 0x10f   : > { %v382_v42 = vadd.f32 %v381_v40, %v380_v38  ;;  %v405_v43 = vrot.slane %v404_v41, 4 }
 0x110   : > { %p744_p10 = pnand %p743_p9, %p737_p5 }
 0x111   : > { %v383_v44 = vrot.slane %v382_v42, 2  ;;  %v406_v45 = vadd.f32 %v405_v43, %v404_v41 }
 0x113   : > { %v384_v46 = vadd.f32 %v383_v44, %v382_v42  ;;  %v407_v47 = vrot.slane %v406_v45, 2 }
 0x115   : > { %v385_v48 = vrot.slane %v384_v46, 1  ;;  %v408_v49 = vadd.f32 %v407_v47, %v406_v45 }
 0x117   : > { %v386_v51 = vadd.f32 %v385_v48, %v384_v46  ;;  %v409_v52 = vrot.slane %v408_v49, 1 }
 0x119   : > { %v387_v54 = vadd.f32 %v386_v51, %v373_v50  ;;  %v410_v55 = vadd.f32 %v409_v52, %v408_v49 }
 0x11b   : > { %388 = vst [vmem:[%s912_s10] sm:$0x1] %v387_v54  ;;  %v411_v56 = vadd.f32 %v410_v55, %v389_v53 }
 0x11d   : > { %412 = vst [vmem:[%s912_s10 + $0x1] sm:$0x1] %v411_v56 }
 0x11e   : > { %747 = shalt.err (!%p744_p10)
}
 0x11f   : > { %s748_s8 = scalar_lea.hbm %s956_s30, 32  ;;  %s752_s11 = scalar_lea.hbm %s1008_s3, 64 }
 0x120   : > { %p749_p11 = scmp.ne.s32.totalorder %s956_s30, %s748_s8  ;;  %p753_p0 = scmp.lt.u32.totalorder %s956_s30, %s1008_s3 }
 0x121   : > { %p754_p1 = scmp.lt.u32.totalorder %s752_s11, %s748_s8  ;;  %p756_p3 = scmp.lt.u32.totalorder %s748_s8, %s956_s30 }
 0x122   : > { %p750_p12 = pnand %p749_p11, %p883_p4 }
 0x123   : > { %p755_p2 = por %p754_p1, %p753_p0 }
 0x124   : > { %p751_p13 = pneg %p750_p12 }
 0x125   : > { %p757_p5 = por %p756_p3, %p755_p2 }
 0x127   : > { %p758_p6 = pnand %p757_p5, %p751_p13 }
 0x129   : > { %761 = shalt.err (!%p758_p6)
}
 0x12a   : > { %638 = dma.vmem_to_hbm [thread:$0]  (%p883_p4), %s958_s27, 32, %s956_s30, %s419_s4  }
 0x12b PF: > { %p648_p7 = scmp.ge.s32.totalorder %s816_s17, 2  ;;  %s461_s23 = sand.u32 1, %s796_s12  }
 0x12c   : > { %s462_s26 = scalar_lea.sflag [#allocation3], %s461_s23 }
 0x12d   : > { %p642_p9 = pnand %p648_p7, %p890_p8 }
 0x12f   : > { %787 = dma.done.wait (!%p642_p9), %s462_s26, 512  }
 0x130   : > { %789 = vsyncadd (!%p642_p9), %s462_s26, 4294966784  ;;  %s471_s19 = scalar_lea.sflag [#allocation5], %s461_s23 }
 0x131   : > { %791 = dma.done.wait (!%p642_p9), %s471_s19, 32  }
 0x132   : > { %793 = vsyncadd (!%p642_p9), %s471_s19, 4294967264  ;;  %s20_s17 = sadd.s32 1, %s816_s17   ;;  %s1011_s12 = smov %s800_s13 }
 0x133   : > { %p17_p10 = scmp.ge.s32.totalorder %s20_s17, 4   ;;  %s1012_s13 = smov %s804_s14 }
 0x134   : > { %s1013_s14 = smov %s896_s25  ;;  %s1014_s15 = smov %s812_s16 }
 0x135   : > { %s1015_s16 = smov %s1017_s20  ;;  %19 = sbr.rel (!%p17_p10) target bundleno = 6 (0x6), region = 84 }
 0x13c   :  { %476 = vsyncpa [#allocation3], 1 }
 0x13d   :  { %478 = vsyncpa [#allocation3 + $0x1], 1 }
 0x13e   :  { %479 = vsyncpa [#allocation5], 1 }
 0x13f   :  { %481 = vsyncpa [#allocation5 + $0x1], 1 }

</bundles_post_ra>
